<compile_context>
chip_gen: v5e
topology: v5e:2x2
jax: 0.10.0
libtpu: 0.0.40
codegen_flags: <defaults>
</compile_context>

<pallas_src>
import functools

import numpy as np
import jax
import jax.numpy as jnp
from jax.experimental import pallas as pl
from jax.experimental.pallas import tpu as pltpu


def _round_up(x, m):
    return ((x + m - 1) // m) * m


def pruned_fm_kernel(e_ref, w_ref, b_ref, lin_ref, o_ref, *, fk, d):
    """Fused block-diag linear projection + FM interaction + sigmoid.

    Batch lives on the LANE axis everywhere.

    e_ref   : (Fk*d, TILE_B) bf16  pruned embeddings (rows zero-padded per field)
    w_ref   : (Fk*d, Fk*d)   bf16  block-diagonal per-field Linear weights
    b_ref   : (Fk*d, 1)      f32   concatenated per-field Linear bias
    lin_ref : (1, TILE_B)    f32   pre-reduced FM first-order term (+ global bias)
    o_ref   : (1, TILE_B)    f32   sigmoid(linear + fm)
    """
    # One MXU matmul for all fields: (Fk*d, Fk*d) @ (Fk*d, TILE_B) -> f32.
    h = jnp.dot(w_ref[...], e_ref[...],
                preferred_element_type=jnp.float32) + b_ref[...]
    # s = sum over fields of h_f  -> (d, TILE_B); Fk is tiny & static.
    s = h[0:d, :]
    for f in range(1, fk):
        s = s + h[f * d:(f + 1) * d, :]
    # FM second-order term: 0.5 * (|sum_f h_f|^2 - sum_f |h_f|^2), per batch lane.
    fm = 0.5 * (jnp.sum(s * s, axis=0, keepdims=True)
                - jnp.sum(h * h, axis=0, keepdims=True))      # (1, TILE_B)
    o_ref[...] = jax.nn.sigmoid(lin_ref[...] + fm)


class PrunedModelPallas:
    """JAX/Pallas re-implementation of PrunedModel (inner model = 'fm')."""

    def __init__(self, key, field_dims, embed_dim, masks):
        masks = np.asarray(masks)
        self.field_dims = list(field_dims)
        self.embed_dim = int(embed_dim)
        self.d = masks.sum(1).astype(np.int32).tolist()
        self.kept = [i for i in range(len(field_dims)) if self.d[i] > 0]
        self.kept_field_dims = [field_dims[i] for i in self.kept]
        self.dmax = int(max(self.d))
        self.fk = len(self.kept)
        self.fkd = self.fk * self.dmax
        self.offsets = np.array((0, *np.cumsum(field_dims)[:-1]), dtype=np.int32)
        total = int(sum(field_dims))

        k = jax.random.split(key, 4)
        # original shared embedding table (sum(field_dims), embed_dim)
        emb_weight = jax.random.normal(k[0], (total, embed_dim), jnp.float32) * 0.1

        # per-field pruned tables: weight[off_i : off_i+fd_i, masks[i] > 0]
        self.emb_tables = []
        for i in self.kept:
            cols = np.nonzero(masks[i] > 0)[0]
            tbl = emb_weight[self.offsets[i]:self.offsets[i] + field_dims[i], :][:, cols]
            self.emb_tables.append(tbl)                    # (field_dims[i], d[i])

        # per-field nn.Linear(d[i], dmax) packed into ONE block-diagonal matrix
        # (output rows, input cols) so the kernel does a single MXU matmul.
        wk = jax.random.split(k[1], self.fk)
        bk = jax.random.split(k[2], self.fk)
        w_bd = np.zeros((self.fkd, self.fkd), np.float32)
        b_col = np.zeros((self.fkd, 1), np.float32)
        for j, i in enumerate(self.kept):
            di = self.d[i]
            bound = 1.0 / np.sqrt(di)
            w = jax.random.uniform(wk[j], (self.dmax, di), jnp.float32, -bound, bound)
            b = jax.random.uniform(bk[j], (self.dmax,), jnp.float32, -bound, bound)
            r0 = j * self.dmax
            w_bd[r0:r0 + self.dmax, r0:r0 + di] = np.asarray(w)
            b_col[r0:r0 + self.dmax, 0] = np.asarray(b)
        self.w_bd = jnp.asarray(w_bd).astype(jnp.bfloat16)   # (Fk*dmax, Fk*dmax) bf16
        self.b_col = jnp.asarray(b_col, jnp.float32)          # (Fk*dmax, 1)      f32

        # inner FM model params over kept fields (FeaturesLinear + global bias)
        kept_total = int(sum(self.kept_field_dims))
        self.fm_fc = jax.random.normal(k[3], (kept_total, 1), jnp.float32) * 0.01
        self.fm_bias = jnp.zeros((), jnp.float32)
        self.kept_offsets = np.array((0, *np.cumsum(self.kept_field_dims)[:-1]),
                                     dtype=np.int32)

    # ---------------------------------------------------------------- glue ----
    def _gather(self, x, b_pad):
        """Embedding gathers (data-dependent) in plain JAX; output is laid out
        with batch on lanes: e_t (Fk*dmax, B_pad) bf16, lin (1, B_pad) f32."""
        B = x.shape[0]
        parts = []
        for j, i in enumerate(self.kept):
            e = jnp.take(self.emb_tables[j], x[:, i], axis=0)              # (B, d_i)
            e = jnp.pad(e, ((0, b_pad - B), (0, self.dmax - self.d[i])))   # (B_pad, dmax)
            parts.append(e)
        e_cat = jnp.concatenate(parts, axis=1)                             # (B_pad, Fk*dmax)
        e_t = e_cat.T.astype(jnp.bfloat16)                                 # (Fk*dmax, B_pad)

        x_ = x[:, np.array(self.kept)]                                     # (B, Fk)
        lin = jnp.take(self.fm_fc[:, 0],
                       x_ + self.kept_offsets[None, :], axis=0)            # (B, Fk)
        lin = jnp.sum(lin, axis=1) + self.fm_bias                          # (B,)
        lin = jnp.pad(lin, (0, b_pad - B)).reshape(1, b_pad)               # (1, B_pad)
        return e_t, lin

    # ------------------------------------------------------------- forward ----
    def __call__(self, x):
        B = x.shape[0]
        tile_b = min(512, _round_up(max(B, 1), 128))     # lane-multiple batch tile
        b_pad = _round_up(B, tile_b)
        e_t, lin = self._gather(x, b_pad)

        kern = functools.partial(pruned_fm_kernel, fk=self.fk, d=self.dmax)
        out = pl.pallas_call(
            kern,
            out_shape=jax.ShapeDtypeStruct((1, b_pad), jnp.float32),
            grid=(b_pad // tile_b,),
            in_specs=[
                # activations: new batch tile every grid step
                pl.BlockSpec((self.fkd, tile_b), lambda i: (0, i)),
                # weights / bias: constant index map -> VMEM-resident
                pl.BlockSpec((self.fkd, self.fkd), lambda i: (0, 0)),
                pl.BlockSpec((self.fkd, 1), lambda i: (0, 0)),
                # pre-reduced first-order term, lane-dense
                pl.BlockSpec((1, tile_b), lambda i: (0, i)),
            ],
            out_specs=pl.BlockSpec((1, tile_b), lambda i: (0, i)),
            compiler_params=pltpu.CompilerParams(
                dimension_semantics=("parallel",),
                vmem_limit_bytes=32 * 1024 * 1024),
        )(e_t, self.w_bd, self.b_col, lin)
        return out[0, :B]                                  # (B,)  == .squeeze(1)


def reference_forward(m, x):
    """Pure-JAX reference of the same semantics (same bf16-cast inputs)."""
    h_list = []
    for j, i in enumerate(m.kept):
        e = jnp.take(m.emb_tables[j], x[:, i], axis=0)                     # (B, d_i)
        e = jnp.pad(e, ((0, 0), (0, m.dmax - m.d[i]))).astype(jnp.bfloat16)
        r0 = j * m.dmax
        w = m.w_bd[r0:r0 + m.dmax, r0:r0 + m.dmax]                         # (dmax, dmax) bf16
        h = jnp.dot(e, w.T, preferred_element_type=jnp.float32) \
            + m.b_col[r0:r0 + m.dmax, 0]
        h_list.append(h)
    embed_x = jnp.stack(h_list, axis=1)                                    # (B, Fk, dmax)
    x_ = x[:, np.array(m.kept)]
    lin = jnp.sum(jnp.take(m.fm_fc[:, 0], x_ + m.kept_offsets[None, :], axis=0),
                  axis=-1) + m.fm_bias
    s = embed_x.sum(axis=1)
    fm = 0.5 * (jnp.sum(s * s, axis=-1)
                - jnp.sum(embed_x * embed_x, axis=(1, 2)))
    return jax.nn.sigmoid(lin + fm)                                        # (B,)


if __name__ == "__main__":
    key = jax.random.PRNGKey(0)
    field_dims = [10, 13, 7, 20]        # 4 fields
    embed_dim = 16
    d_keep = [6, 0, 16, 9]              # field 1 fully pruned (d==0) -> dropped
    masks = np.zeros((len(field_dims), embed_dim), dtype=np.float32)
    for i, di in enumerate(d_keep):
        masks[i, :di] = 1.0

    kparam, kx = jax.random.split(key)
    model = PrunedModelPallas(kparam, field_dims, embed_dim, masks)

    B = 8
    kxs = jax.random.split(kx, len(field_dims))
    cols = [jax.random.randint(kxs[i], (B,), 0, field_dims[i], jnp.int32)
            for i in range(len(field_dims))]
    x = jnp.stack(cols, axis=1)          # (B, F) per-field indices, as in PyTorch

    out = model(x)
    jax.block_until_ready(out)

    ref = reference_forward(model, x)
    assert out.shape == (B,)
    assert jnp.allclose(out, ref, atol=1e-4, rtol=1e-4), (out, ref)
    print("KERNEL_OK")
</pallas_src>

<mosaic_0001>
module attributes {stable_mosaic.version = 11 : i64} {
  func.func @pruned_fm_kernel(%arg0: i32, %arg1: memref<48x128xbf16, #tpu.memory_space<vmem>>, %arg2: memref<48x48xbf16, #tpu.memory_space<vmem>>, %arg3: memref<48x1xf32, #tpu.memory_space<vmem>>, %arg4: memref<1x128xf32, #tpu.memory_space<vmem>>, %arg5: memref<1x128xf32, #tpu.memory_space<vmem>>) attributes {dimension_semantics = [#tpu.dimension_semantics<parallel>], iteration_bounds = array<i64: 1>, scalar_prefetch = 0 : i64, scratch_operands = 0 : i64, tpu.core_type = #tpu.core_type<tc>, window_params = [{transform_indices = @transform_0, window_bounds = array<i64: 48, 128>}, {pipeline_mode = #tpu.pipeline_mode<synchronous>, transform_indices = @transform_1, window_bounds = array<i64: 48, 48>}, {pipeline_mode = #tpu.pipeline_mode<synchronous>, transform_indices = @transform_2, window_bounds = array<i64: 48, 1>}, {transform_indices = @transform_3, window_bounds = array<i64: 1, 128>}, {transform_indices = @transform_4, window_bounds = array<i64: 1, 128>}]} {
    %c0 = arith.constant 0 : index
    %c0_0 = arith.constant 0 : index
    %0 = vector.load %arg2[%c0, %c0_0] : memref<48x48xbf16, #tpu.memory_space<vmem>>, vector<48x48xbf16>
    %c0_1 = arith.constant 0 : index
    %c0_2 = arith.constant 0 : index
    %1 = vector.load %arg1[%c0_1, %c0_2] : memref<48x128xbf16, #tpu.memory_space<vmem>>, vector<48x128xbf16>
    %cst = arith.constant dense<0.000000e+00> : vector<48x128xf32>
    %2 = tpu.matmul %0, %1, %cst {dimension_numbers = #tpu.dot_dimension_numbers<[1], [0], [0], [1], [0, 0, 1, 1], [], []>} : vector<48x48xbf16>, vector<48x128xbf16>, vector<48x128xf32> -> vector<48x128xf32>
    %c0_3 = arith.constant 0 : index
    %c0_4 = arith.constant 0 : index
    %3 = vector.load %arg3[%c0_3, %c0_4] : memref<48x1xf32, #tpu.memory_space<vmem>>, vector<48x1xf32>
    %4 = vector.broadcast %3 : vector<48x1xf32> to vector<48x128xf32>
    %5 = arith.addf %2, %4 : vector<48x128xf32>
    %6 = vector.extract_strided_slice %5 {offsets = [0, 0], sizes = [16, 128], strides = [1, 1]} : vector<48x128xf32> to vector<16x128xf32>
    %7 = vector.extract_strided_slice %5 {offsets = [16, 0], sizes = [16, 128], strides = [1, 1]} : vector<48x128xf32> to vector<16x128xf32>
    %8 = arith.addf %6, %7 : vector<16x128xf32>
    %9 = vector.extract_strided_slice %5 {offsets = [32, 0], sizes = [16, 128], strides = [1, 1]} : vector<48x128xf32> to vector<16x128xf32>
    %10 = arith.addf %8, %9 : vector<16x128xf32>
    %11 = arith.mulf %10, %10 : vector<16x128xf32>
    %cst_5 = arith.constant dense<0.000000e+00> : vector<128xf32>
    %12 = vector.multi_reduction <add>, %11, %cst_5 [0] : vector<16x128xf32> to vector<128xf32>
    %13 = vector.shape_cast %12 : vector<128xf32> to vector<1x128xf32>
    %14 = arith.mulf %5, %5 : vector<48x128xf32>
    %cst_6 = arith.constant dense<0.000000e+00> : vector<128xf32>
    %15 = vector.multi_reduction <add>, %14, %cst_6 [0] : vector<48x128xf32> to vector<128xf32>
    %16 = vector.shape_cast %15 : vector<128xf32> to vector<1x128xf32>
    %17 = arith.subf %13, %16 : vector<1x128xf32>
    %cst_7 = arith.constant 5.000000e-01 : f32
    %18 = vector.broadcast %cst_7 : f32 to vector<1x128xf32>
    %19 = arith.mulf %18, %17 : vector<1x128xf32>
    %c0_8 = arith.constant 0 : index
    %c0_9 = arith.constant 0 : index
    %20 = vector.load %arg4[%c0_8, %c0_9] : memref<1x128xf32, #tpu.memory_space<vmem>>, vector<1x128xf32>
    %21 = arith.addf %20, %19 : vector<1x128xf32>
    %22 = arith.negf %21 : vector<1x128xf32>
    %23 = math.exp %22 : vector<1x128xf32>
    %cst_10 = arith.constant 1.000000e+00 : f32
    %24 = vector.broadcast %cst_10 : f32 to vector<1x128xf32>
    %25 = arith.addf %24, %23 : vector<1x128xf32>
    %26 = arith.divf %24, %25 : vector<1x128xf32>
    %c0_11 = arith.constant 0 : index
    %c0_12 = arith.constant 0 : index
    %27 = vector.load %arg5[%c0_11, %c0_12] : memref<1x128xf32, #tpu.memory_space<vmem>>, vector<1x128xf32>
    tpu.vector_store %arg5[%c0_11, %c0_12], %26 {strides = array<i32>} : memref<1x128xf32, #tpu.memory_space<vmem>>, vector<1x128xf32>,
    return
  }
  func.func @transform_0(%arg0: i32) -> (i32, i32) {
    %c0_i32 = arith.constant 0 : i32
    %c0_i32_0 = arith.constant 0 : i32
    return %c0_i32, %arg0 : i32, i32
  }
  func.func @transform_1(%arg0: i32) -> (i32, i32) {
    %c0_i32 = arith.constant 0 : i32
    %c0_i32_0 = arith.constant 0 : i32
    %c0_i32_1 = arith.constant 0 : i32
    return %c0_i32, %c0_i32_0 : i32, i32
  }
  func.func @transform_2(%arg0: i32) -> (i32, i32) {
    %c0_i32 = arith.constant 0 : i32
    %c0_i32_0 = arith.constant 0 : i32
    %c0_i32_1 = arith.constant 0 : i32
    return %c0_i32, %c0_i32_0 : i32, i32
  }
  func.func @transform_3(%arg0: i32) -> (i32, i32) {
    %c0_i32 = arith.constant 0 : i32
    %c0_i32_0 = arith.constant 0 : i32
    return %c0_i32, %arg0 : i32, i32
  }
  func.func @transform_4(%arg0: i32) -> (i32, i32) {
    %c0_i32 = arith.constant 0 : i32
    %c0_i32_0 = arith.constant 0 : i32
    return %c0_i32, %arg0 : i32, i32
  }
}

</mosaic_0001>

<bundles_post_ra>
// kernel: tpu_custom_call.1
= control target key start
LH: loop header
LB: loop body
LE: loop exit
PB: predicated region body
PF: predicated region fallthrough
CT: control target
= control target key end

     0   :  { %v279_v1 = vmov 0   ;;  %s348_s0 = inlined_call_operand.vmem [shape: bf16[48,128], index: 0, kind: input, shape index: {}]   ;;  %s349_s1 = inlined_call_operand.vmem [shape: bf16[48,48], index: 1, kind: input, shape index: {}]   ;;  %s350_s2 = inlined_call_operand.vmem [shape: f32[48,1], index: 2, kind: input, shape index: {}]   ;;  %s351_s3 = inlined_call_operand.vmem [shape: f32[1,128], index: 3, kind: input, shape index: {}]   ;;  %s352_s4 = inlined_call_operand.hbm [shape: f32[1,128], index: 4, kind: output, shape index: {}]  }
   0x1   :  { %v237_v0 = vld [vmem:[%s348_s0 + $0x10] sm:$0xff]  ;;  %246 = vset.pattern.permute.xlu0 %v279_v1  ;;  %247 = vset.pattern.permute.xlu1 %v279_v1  ;;  %v236_v2 = vld [vmem:[%s348_s0 + $0x8] sm:$0xff]  ;;  %v31_v3 = vld [vmem:[%s350_s2] sm:$0xff] }
   0x2   :  { %115 = vmatpush.bf16.msra.mxu0 %v237_v0  ;;  %238 = vmatpush.bf16.msra.mxu1 %v237_v0  ;;  %v33_v4 = vld [vmem:[%s350_s2 + $0x10] sm:$0xff]  ;;  %v35_v5 = vld [vmem:[%s350_s2 + $0x20] sm:$0xff] }
   0x3   :  { %239 = vmatpush.bf16.msra.mxu2 %v237_v0  ;;  %39 = vperm.xlu0 %246, %v31_v3  }
   0x4   :  { %49 = vperm.xlu1 %247, %v33_v4   ;;  %248 = vset.pattern.permute.xlu2 %v279_v1 }
   0x5   :  { %9 = vsyncpa [#allocation3], 0  ;;  %59 = vperm.xlu2 %248, %v35_v5   ;;  %v235_v6 = vld [vmem:[%s348_s0] sm:$0xff]  ;;  %v32_v7 = vld [vmem:[%s350_s2 + $0x8] sm:$0xff]  ;;  %vm100_vm0 = vcmask 392192   ;;  %s280_s12 = smov [#allocation2]  }
   0x6   :  { %116 = vmatpush.bf16.msra.mxu0 %v236_v2  ;;  %240 = vmatpush.bf16.msra.mxu1 %v236_v2  ;;  %v232_v8 = vld [vmem:[%s349_s1] sm:$0xff]  ;;  %v233_v9 = vld [vmem:[%s349_s1 + $0x8] sm:$0xff]  ;;  %v34_v10 = vld [vmem:[%s350_s2 + $0x18] sm:$0xff]  ;;  %s193_s13 = sshll.u32 %s280_s12, 4  ;;  %s194_s13 = int_to_ptr.vmem [resolvable:$true] %s193_s13 }
   0x7   :  { %241 = vmatpush.bf16.msra.mxu2 %v236_v2  ;;  %v234_v11 = vld [vmem:[%s349_s1 + $0x10] sm:$0xff]  ;;  %v36_v12 = vld [vmem:[%s350_s2 + $0x28] sm:$0xff]  ;;  %v166_v62 = vld [vmem:[%s351_s3] sm:$0x1]  ;;  %s195_s3 = sshll.u32 %s352_s4, 4  ;;  %s196_s3 = int_to_ptr.hbm [resolvable:$true] %s195_s3 }
   0xa   :  { %117 = vmatpush.bf16.msra.mxu0 %v235_v6  ;;  %242 = vmatpush.bf16.msra.mxu1 %v235_v6 }
   0xb   :  { %243 = vmatpush.bf16.msra.mxu2 %v235_v6  ;;  %44 = vperm.xlu0 %246, %v32_v7  }
   0xc   :  { %54 = vperm.xlu1 %247, %v34_v10  }
   0xd   :  { %228 = vmatmul.msk.bf16.vlgmr.msra.gmra.mxu0 %vm100_vm0, %v232_v8  ;;  %229 = vmatmul.msk.bf16.vlgmr.msra.gmra.mxu1 %vm100_vm0, %v233_v9 }
   0xe   :  { %230 = vmatmul.msk.bf16.vlgmr.msra.gmra.mxu2 %vm100_vm0, %v234_v11  ;;  %64 = vperm.xlu2 %248, %v36_v12  }
  0x5f   :  { %v60_v17 = vpop.permute.xlu2 %59 }
  0x68   :  { %v65_v33 = vpop.permute.xlu2 %64 }
  0x75   :  { %v40_v13 = vpop.permute.xlu0 %39 }
  0x76   :  { %v50_v14 = vpop.permute.xlu1 %49 }
  0x7d   :  { %v45_v18 = vpop.permute.xlu0 %44 }
  0x7e   :  { %v55_v25 = vpop.permute.xlu1 %54 }
  0x8a   :  { %v119_v15 = vpop.f32.mrf.mxu0  ;;  %v124_v16 = vpop.f32.mrf.mxu1 }
  0x8b   :  { %v120_v19 = vadd.f32 %v119_v15, %v40_v13  ;;  %v125_v24 = vadd.f32 %v124_v16, %v50_v14 }
  0x8d   :  { %v147_v26 = vmul.f32 %v120_v19, %v120_v19  ;;  %v149_v30 = vmul.f32 %v125_v24, %v125_v24  ;;  %v134_v32 = vadd.f32 %v125_v24, %v120_v19 }
  0x91   :  { %v129_v20 = vpop.f32.mrf.mxu2 }
  0x92   :  { %v121_v21 = vpop.f32.mrf.mxu0  ;;  %v126_v22 = vpop.f32.mrf.mxu1  ;;  %v130_v29 = vadd.f32 %v129_v20, %v60_v17 }
  0x93   :  { %v122_v23 = vadd.f32 %v121_v21, %v45_v18  ;;  %v127_v28 = vadd.f32 %v126_v22, %v55_v25 }
  0x94   :  { %v136_v37 = vadd.f32 %v134_v32, %v130_v29  ;;  %v151_v40 = vmul.f32 %v130_v29, %v130_v29 }
  0x95   :  { %v148_v27 = vmul.f32 %v122_v23, %v122_v23  ;;  %v150_v34 = vmul.f32 %v127_v28, %v127_v28  ;;  %v135_v38 = vadd.f32 %v127_v28, %v122_v23 }
  0x96   :  { %v138_v45 = vmul.f32 %v136_v37, %v136_v37 }
  0x97   :  { %v153_v31 = vadd.f32 %v148_v27, %v147_v26 }
  0x99   :  { %v154_v35 = vadd.f32 %v153_v31, %v149_v30  ;;  %v131_v36 = vpop.f32.mrf.mxu2 }
  0x9a   :  { %v132_v39 = vadd.f32 %v131_v36, %v65_v33 }
  0x9b   :  { %v155_v41 = vadd.f32 %v154_v35, %v150_v34 }
  0x9c   :  { %v137_v42 = vadd.f32 %v135_v38, %v132_v39  ;;  %v152_v43 = vmul.f32 %v132_v39, %v132_v39 }
  0x9d   :  { %v156_v44 = vadd.f32 %v155_v41, %v151_v40 }
  0x9e   :  { %v139_v46 = vmul.f32 %v137_v42, %v137_v42 }
  0x9f   :  { %v157_v47 = vadd.f32 %v156_v44, %v152_v43 }
  0xa0   :  { %v140_v48 = vadd.f32 %v139_v46, %v138_v45 }
  0xa1   :  { %v158_v49 = vrot.slane %v157_v47, 4 }
  0xa2   :  { %v141_v50 = vrot.slane %v140_v48, 4 }
  0xa3   :  { %v159_v51 = vadd.f32 %v158_v49, %v157_v47 }
  0xa4   :  { %v142_v52 = vadd.f32 %v141_v50, %v140_v48 }
  0xa5   :  { %v160_v53 = vrot.slane %v159_v51, 2 }
  0xa6   :  { %v143_v54 = vrot.slane %v142_v52, 2 }
  0xa7   :  { %v161_v55 = vadd.f32 %v160_v53, %v159_v51 }
  0xa8   :  { %v144_v56 = vadd.f32 %v143_v54, %v142_v52 }
  0xa9   :  { %v162_v57 = vrot.slane %v161_v55, 1 }
  0xaa   :  { %v145_v58 = vrot.slane %v144_v56, 1 }
  0xab   :  { %v163_v59 = vadd.f32 %v162_v57, %v161_v55 }
  0xac   :  { %v146_v60 = vadd.f32 %v145_v58, %v144_v56 }
  0xae   :  { %v164_v61 = vsub.f32 %v146_v60, %v163_v59 }
  0xb0   :  { %v165_v63 = vmul.f32 0.5, %v164_v61 }
  0xb2   :  { %v167_v0 = vadd.f32 %v166_v62, %v165_v63 }
  0xb4   :  { %v231_v1 = vmul.f32 -1.442695, %v167_v0 }
  0xb6   :  { %249 = vpow2.f32 %v231_v1 }
  0xbc   :  { %v250_v2 = vpop.eup %249 }
  0xbd   :  { %v171_v3 = vadd.f32 1.0, %v250_v2 }
  0xbf   :  { %251 = vrcp.f32 %v171_v3  ;;  %v183_v7 = vand.u32 2147483648, %v171_v3  ;;  %v181_v9 = vand.u32 2147483647, %v171_v3  ;;  %vm177_vm2 = vweird.f32 %v171_v3 }
  0xc1   :  { %v184_v11 = vor.u32 1.1754944e-38, %v183_v7  ;;  %vm182_vm4 = vcmp.eq.f32.partialorder %v181_v9, 8.507059e+37 }
  0xc5   :  { %v252_v4 = vpop.eup %251 }
  0xc6   :  { %v173_v5 = vmul.f32 %v252_v4, %v171_v3  ;;  %vm178_vm1 = vweird.f32 %v252_v4 }
  0xc7   :  { %vm179_vm3 = vmor %vm177_vm2, %vm178_vm1 }
  0xc8   :  { %v174_v6 = vsub.f32 1.0, %v173_v5 }
  0xca   :  { %v175_v8 = vmul.f32 %v252_v4, %v174_v6 }
  0xcc   :  { %v176_v10 = vadd.f32 %v252_v4, %v175_v8 }
  0xce   :  { %v180_v12 = vsel %vm179_vm3, %v252_v4, %v176_v10 }
  0xcf   :  { %v185_v13 = vsel %vm182_vm4, %v184_v11, %v180_v12 }
  0xd0   :  { %187 = vst [vmem:[#allocation2] sm:$0x1] %v185_v13 }
  0xd1   :  { %198 = dma.vmem_to_hbm [thread:$0]  %s194_s13, 16, %s196_s3, [#allocation3]  }
  0xd2   :  { %277 = dma.done.wait [#allocation3], 16  }
  0xd3   :  { %278 = vsyncadd [#allocation3], 4294967280 }
  0xd4   :  { %203 = vsyncpa [#allocation3], 1 }

</bundles_post_ra>
